<compile_context>
chip_gen: v5e
topology: v5e:2x2
jax: 0.10.0
libtpu: 0.0.40
codegen_flags: <defaults>
</compile_context>

<pallas_src>
import functools

import jax
import jax.numpy as jnp
from jax.experimental import pallas as pl
from jax.experimental.pallas import tpu as pltpu


def _round_up(x: int, m: int) -> int:
    return ((x + m - 1) // m) * m


def _cdiv(a: int, b: int) -> int:
    return (a + b - 1) // b


# Conservative VMEM budget for the working set: fits every generation
# (v5e/v6e 128 MiB physical, v7x 64 MiB physical).
_VMEM_BUDGET = 40 << 20
# Resident (constant-index_map) weights bigger than this get single-buffered.
_SINGLE_BUFFER_WEIGHT_BYTES = 2 << 20


def _linear_kernel(x_ref, w_ref, b_ref, o_ref, *, compute_dtype):
    # x_ref: (TM, K)  w_ref: (K, TN)  b_ref: (1, TN)  o_ref: (TM, TN)
    x = x_ref[...]
    if x.dtype != compute_dtype:
        # In-kernel cast rides a VPU slot under the MXU; a wrapper-side cast
        # would be a separate full read+write HBM pass over x.
        x = x.astype(compute_dtype)
    acc = jnp.dot(x, w_ref[...], preferred_element_type=jnp.float32)
    # Bias add at f32 accumulator precision, in-kernel (free VALU slot).
    o_ref[...] = (acc + b_ref[...]).astype(o_ref.dtype)


def _choose_tiles(B, in_sz, out_sz, x_bytes, w_bytes, out_bytes, align, tm_req):
    """Pick (TM, TN, single_buffer_weight, vmem_bytes_needed) within budget."""
    # Cap TM so large batches give >=2 grid steps on the 'parallel' axis
    # (lets v7x shard the batch across its 2 TensorCores); no-op for small B.
    tm_cap = min(tm_req, max(256, _round_up(_cdiv(B, 2), align)))
    tm = max(align, min(tm_cap, _round_up(B, align)))

    def need(tm_, tn_, wbufs_):
        return (2 * tm_ * in_sz * x_bytes        # x tile, double-buffered
                + 2 * tm_ * tn_ * out_bytes      # out tile, double-buffered
                + wbufs_ * in_sz * tn_ * w_bytes # weight tile(s)
                + wbufs_ * tn_ * 4               # f32 bias row
                + (1 << 20))                     # slack for compiler scratch

    w_full = in_sz * out_sz * w_bytes
    wbufs_res = 1 if w_full > _SINGLE_BUFFER_WEIGHT_BYTES else 2

    if out_sz > 256 and need(tm, out_sz, wbufs_res) > _VMEM_BUDGET:
        # Weight too large to keep fully resident: tile N in 256-wide
        # (MXU-full on v6e/v7x) chunks; weight blocks now stream, so keep the
        # default double buffering for them.
        tn, wbufs = 256, 2
    else:
        tn, wbufs = out_sz, wbufs_res

    while tm > align and need(tm, tn, wbufs) > _VMEM_BUDGET:
        tm = max(align, _round_up(tm // 2, align))

    single_w = (tn == out_sz and wbufs == 1)
    return tm, tn, single_w, need(tm, tn, wbufs)


@functools.partial(jax.jit, static_argnames=("tm", "compute_dtype"))
def linear_regression_forward(x, w_t, b, *, tm: int = 512, compute_dtype=None):
    """y = x @ w_t + b  via a batch-tiled Pallas kernel (no wrapper padding).

    x:   [B, inputSize]            (read once from HBM, never padded/copied)
    w_t: [inputSize, outputSize]   (transpose of torch's weight)
    b:   [outputSize]
    returns: [B, outputSize] with the dtype of x.
    """
    B, in_sz = x.shape
    out_sz = w_t.shape[1]
    out_dtype = x.dtype
    cdt = jnp.dtype(compute_dtype) if compute_dtype is not None else jnp.dtype(x.dtype)

    x_bytes = jnp.dtype(x.dtype).itemsize
    w_bytes = cdt.itemsize
    out_bytes = jnp.dtype(out_dtype).itemsize
    # Sub-32-bit dtypes pack along sublanes: align TM to 8/16/32 accordingly.
    align = 32 // min(x_bytes, w_bytes, out_bytes)

    tm_eff, tn, single_w, vmem_need = _choose_tiles(
        B, in_sz, out_sz, x_bytes, w_bytes, out_bytes, align, tm)

    # One-time operand prep (tiny next to x for large B): weight in compute
    # dtype, bias as an f32 row so the add happens at accumulator precision.
    w_c = w_t.astype(cdt) if w_t.dtype != cdt else w_t
    b_row = b.astype(jnp.float32).reshape(1, out_sz)

    kernel = functools.partial(_linear_kernel, compute_dtype=cdt)

    if tn == out_sz:
        # Whole weight + bias resident in VMEM; batch-only cdiv grid with a
        # ragged (masked) last tile -> no batch padding, no output slice.
        grid = (_cdiv(B, tm_eff),)
        x_map = lambda i: (i, 0)
        res_map = lambda i: (0, 0)
        o_map = lambda i: (i, 0)
        semantics = ("parallel",)
        if single_w:
            # Constant index_map => nothing to pipeline; single-buffer to
            # halve the resident weight's VMEM footprint (key on v7x).
            w_spec = pl.BlockSpec((in_sz, out_sz), res_map,
                                  pipeline_mode=pl.Buffered(1))
            b_spec = pl.BlockSpec((1, out_sz), res_map,
                                  pipeline_mode=pl.Buffered(1))
        else:
            w_spec = pl.BlockSpec((in_sz, out_sz), res_map)
            b_spec = pl.BlockSpec((1, out_sz), res_map)
    else:
        # Large layer: tile N in 256-wide chunks (both grid axes independent).
        grid = (_cdiv(B, tm_eff), _cdiv(out_sz, tn))
        x_map = lambda i, j: (i, 0)
        o_map = lambda i, j: (i, j)
        semantics = ("parallel", "parallel")
        w_spec = pl.BlockSpec((in_sz, tn), lambda i, j: (0, j))
        b_spec = pl.BlockSpec((1, tn), lambda i, j: (0, j))
    # TODO(synk): add a K grid axis + f32 VMEM accumulator (init/finalize via
    # pl.when) for very large inputSize where (in_sz, tn) tiles overflow VMEM.

    vmem_limit = int(min(max(2 * vmem_need, 16 << 20), 50 << 20))

    out = pl.pallas_call(
        kernel,
        out_shape=jax.ShapeDtypeStruct((B, out_sz), out_dtype),
        grid=grid,
        in_specs=[pl.BlockSpec((tm_eff, in_sz), x_map), w_spec, b_spec],
        out_specs=pl.BlockSpec((tm_eff, tn), o_map),
        compiler_params=pltpu.CompilerParams(
            dimension_semantics=semantics,
            vmem_limit_bytes=vmem_limit,
        ),
    )(x, w_c, b_row)

    return out


if __name__ == "__main__":
    # Module config: linearRegression(inputSize=32, outputSize=16)
    input_size = 32
    output_size = 16
    batch = 8

    key = jax.random.PRNGKey(0)
    kx, kw, kb, kx2 = jax.random.split(key, 4)

    # Deterministic parameter init mimicking torch.nn.Linear default
    # (uniform in +/- 1/sqrt(inputSize)); torch weight is [outputSize, inputSize].
    bound = 1.0 / (input_size ** 0.5)
    w_torch = jax.random.uniform(
        kw, (output_size, input_size), jnp.float32, -bound, bound)
    w_t = w_torch.T  # [inputSize, outputSize]
    b = jax.random.uniform(kb, (output_size,), jnp.float32, -bound, bound)

    x = jax.random.normal(kx, (batch, input_size), jnp.float32)
    ref = x @ w_t + b

    # --- f32 path: exact-precision check ------------------------------------
    out_f32 = jax.block_until_ready(linear_regression_forward(x, w_t, b))
    assert out_f32.shape == (batch, output_size)
    assert jnp.allclose(out_f32, ref, atol=1e-5, rtol=1e-5)

    # --- bf16 compute path (in-kernel cast, f32 accumulation) ---------------
    out_bf16 = jax.block_until_ready(
        linear_regression_forward(x, w_t, b, compute_dtype=jnp.bfloat16))
    assert out_bf16.shape == (batch, output_size)
    assert jnp.allclose(out_bf16, ref, atol=5e-2, rtol=5e-2)

    # --- ragged batch: exercises the cdiv grid + masked last tile ------------
    x2 = jax.random.normal(kx2, (20, input_size), jnp.float32)
    ref2 = x2 @ w_t + b
    out2 = jax.block_until_ready(linear_regression_forward(x2, w_t, b, tm=8))
    assert out2.shape == (20, output_size)
    assert jnp.allclose(out2, ref2, atol=1e-5, rtol=1e-5)

    print("KERNEL_OK")
</pallas_src>

<mosaic_0001>
module attributes {stable_mosaic.version = 11 : i64} {
  func.func @_linear_kernel(%arg0: i32, %arg1: memref<8x32xf32, #tpu.memory_space<vmem>>, %arg2: memref<32x16xf32, #tpu.memory_space<vmem>>, %arg3: memref<1x16xf32, #tpu.memory_space<vmem>>, %arg4: memref<8x16xf32, #tpu.memory_space<vmem>>) attributes {dimension_semantics = [#tpu.dimension_semantics<parallel>], iteration_bounds = array<i64: 1>, scalar_prefetch = 0 : i64, scratch_operands = 0 : i64, tpu.core_type = #tpu.core_type<tc>, window_params = [{transform_indices = @transform_0, window_bounds = array<i64: 8, 32>}, {pipeline_mode = #tpu.pipeline_mode<synchronous>, transform_indices = @transform_1, window_bounds = array<i64: 32, 16>}, {pipeline_mode = #tpu.pipeline_mode<synchronous>, transform_indices = @transform_2, window_bounds = array<i64: 1, 16>}, {transform_indices = @transform_3, window_bounds = array<i64: 8, 16>}]} {
    %c0 = arith.constant 0 : index
    %c0_0 = arith.constant 0 : index
    %0 = vector.load %arg1[%c0, %c0_0] : memref<8x32xf32, #tpu.memory_space<vmem>>, vector<8x32xf32>
    %c0_1 = arith.constant 0 : index
    %c0_2 = arith.constant 0 : index
    %1 = vector.load %arg2[%c0_1, %c0_2] : memref<32x16xf32, #tpu.memory_space<vmem>>, vector<32x16xf32>
    %cst = arith.constant dense<0.000000e+00> : vector<8x16xf32>
    %2 = tpu.matmul %0, %1, %cst {dimension_numbers = #tpu.dot_dimension_numbers<[1], [0], [0], [1], [0, 0, 1, 1], [], []>} : vector<8x32xf32>, vector<32x16xf32>, vector<8x16xf32> -> vector<8x16xf32>
    %c0_3 = arith.constant 0 : index
    %c0_4 = arith.constant 0 : index
    %3 = vector.load %arg3[%c0_3, %c0_4] : memref<1x16xf32, #tpu.memory_space<vmem>>, vector<1x16xf32>
    %4 = vector.broadcast %3 : vector<1x16xf32> to vector<8x16xf32>
    %5 = arith.addf %2, %4 : vector<8x16xf32>
    %c0_5 = arith.constant 0 : index
    %c0_6 = arith.constant 0 : index
    %6 = vector.load %arg4[%c0_5, %c0_6] : memref<8x16xf32, #tpu.memory_space<vmem>>, vector<8x16xf32>
    tpu.vector_store %arg4[%c0_5, %c0_6], %5 {strides = array<i32>} : memref<8x16xf32, #tpu.memory_space<vmem>>, vector<8x16xf32>,
    return
  }
  func.func @transform_0(%arg0: i32) -> (i32, i32) {
    %c0_i32 = arith.constant 0 : i32
    %c0_i32_0 = arith.constant 0 : i32
    return %arg0, %c0_i32 : i32, i32
  }
  func.func @transform_1(%arg0: i32) -> (i32, i32) {
    %c0_i32 = arith.constant 0 : i32
    %c0_i32_0 = arith.constant 0 : i32
    %c0_i32_1 = arith.constant 0 : i32
    return %c0_i32, %c0_i32_0 : i32, i32
  }
  func.func @transform_2(%arg0: i32) -> (i32, i32) {
    %c0_i32 = arith.constant 0 : i32
    %c0_i32_0 = arith.constant 0 : i32
    %c0_i32_1 = arith.constant 0 : i32
    return %c0_i32, %c0_i32_0 : i32, i32
  }
  func.func @transform_3(%arg0: i32) -> (i32, i32) {
    %c0_i32 = arith.constant 0 : i32
    %c0_i32_0 = arith.constant 0 : i32
    return %arg0, %c0_i32 : i32, i32
  }
}

</mosaic_0001>

<bundles_post_ra>
// kernel: linear_regression_forward.1
= control target key start
LH: loop header
LB: loop body
LE: loop exit
PB: predicated region body
PF: predicated region fallthrough
CT: control target
= control target key end

     0   :  { %s137_s0 = inlined_call_operand.vmem [shape: f32[8,32], index: 0, kind: input, shape index: {}]   ;;  %s138_s1 = inlined_call_operand.vmem [shape: f32[32,16], index: 1, kind: input, shape index: {}]   ;;  %s139_s2 = inlined_call_operand.vmem [shape: f32[1,16], index: 2, kind: input, shape index: {}]   ;;  %s140_s3 = inlined_call_operand.hbm [shape: f32[8,16], index: 3, kind: output, shape index: {}]  }
   0x1   :  { %v19_v0 = vld [vmem:[%s138_s1 + $0x18] sm:$0xff]  ;;  %v18_v1 = vld [vmem:[%s138_s1 + $0x10] sm:$0xff]  ;;  %v17_v2 = vld [vmem:[%s138_s1 + $0x8] sm:$0xff] }
   0x2   :  { %40 = vmatpush.msra.mxu0 %v19_v0 }
   0x3   :  { %8 = vsyncpa [#allocation3], 0  ;;  %v16_v3 = vld [vmem:[%s138_s1] sm:$0xff]  ;;  %vm24_vm0 = vcmask 261120   ;;  %s95_s24 = smov [#allocation2]   ;;  %s57_s28 = sshll.u32 %s140_s3, 4  ;;  %s58_s28 = int_to_ptr.hbm [resolvable:$true] %s57_s28 }
   0x4   :  { %41 = vmatpush.msra.mxu0 %v18_v1  ;;  %v15_v4 = vld [vmem:[%s137_s0] sm:$0xff]  ;;  %s55_s25 = sshll.u32 %s95_s24, 4  ;;  %vm48_vm1 = vcmask 130048   ;;  %s56_s25 = int_to_ptr.vmem [resolvable:$true] %s55_s25 }
   0x5   :  { %v68_v5 = vld [vmem:[%s139_s2] ss:$0 sm:$0xff] }
   0x6   :  { %42 = vmatpush.msra.mxu0 %v17_v2 }
   0x8   :  { %43 = vmatpush.msra.mxu0 %v16_v3 }
   0x9   :  { %66 = vmatmul.msk.f32.vlgmr.msra.gmra.mxu0 %vm24_vm0, %v15_v4 }
  0x86   :  { %v45_v6 = vpop.f32.mrf.mxu0 }
  0x87   :  { %v46_v7 = vadd.f32 %v68_v5, %v45_v6 }
  0x89   :  { %49 = vst.msk [vmem:[#allocation2] sm:$0xff] %vm48_vm1, %v46_v7 }
  0x8a   :  { %60 = dma.vmem_to_hbm [thread:$0]  %s56_s25, 128, %s58_s28, [#allocation3]  }
  0x8b   :  { %93 = dma.done.wait [#allocation3], 128  }
  0x8c   :  { %94 = vsyncadd [#allocation3], 4294967168 }
  0x8d   :  { %65 = vsyncpa [#allocation3], 1 }

</bundles_post_ra>
